<compile_context>
chip_gen: v6e
topology: v6e:2x2x1
jax: 0.10.0
libtpu: 0.0.40
codegen_flags: <defaults>
</compile_context>

<pallas_src>
import functools

import jax
import jax.numpy as jnp
from jax.experimental import pallas as pl
from jax.experimental.pallas import tpu as pltpu

_LANE = 128
_SUBLANE = 8


def _round_up(x, m):
    return (x + m - 1) // m * m


def _policy_kernel(a1_dim, a2_dim, total_padded):
    """Kernel closure with static split sizes and padded output width."""
    total = a1_dim + a2_dim

    def kernel(x_ref, w1_ref, b1_ref, w2_ref, b2_ref, w3_ref, b3_ref, out_ref):
        x = x_ref[...]                                              # [TB, S]

        # fc1 + relu
        h = jnp.dot(x, w1_ref[...], preferred_element_type=jnp.float32) + b1_ref[...]
        h = jnp.maximum(h, 0.0)
        # fc2 + relu
        h = jnp.dot(h, w2_ref[...], preferred_element_type=jnp.float32) + b2_ref[...]
        h = jnp.maximum(h, 0.0)
        # fc3: both heads' logits concatenated along the lane axis; padded
        # columns carry zero weights/bias and are sliced off in the wrapper.
        logits = jnp.dot(h, w3_ref[...], preferred_element_type=jnp.float32) + b3_ref[...]

        tb = logits.shape[0]
        # Segment masks (2-D iota is required on TPU), computed once per tile.
        col = jax.lax.broadcasted_iota(jnp.int32, (tb, total_padded), 1)
        seg1 = col < a1_dim
        seg2 = jnp.logical_and(col >= a1_dim, col < total)

        neg_inf = jnp.float32(-jnp.inf)
        m1 = jnp.max(jnp.where(seg1, logits, neg_inf), axis=-1, keepdims=True)
        m2 = jnp.max(jnp.where(seg2, logits, neg_inf), axis=-1, keepdims=True)

        # Single exp over the whole tile (half the EUP work vs two exps).
        m = jnp.where(seg1, m1, m2)
        e = jnp.exp(logits - m)

        s1 = jnp.sum(jnp.where(seg1, e, 0.0), axis=-1, keepdims=True)
        s2 = jnp.sum(jnp.where(seg2, e, 0.0), axis=-1, keepdims=True)

        # approx=False keeps the result within 1e-5 of the f32 reference.
        inv = jnp.where(seg1,
                        pl.reciprocal(s1, approx=False),
                        pl.reciprocal(s2, approx=False))
        out_ref[...] = e * inv   # padded columns hold garbage; sliced off outside

    return kernel


@functools.partial(jax.jit, static_argnames=("action_dim_lst", "block_batch"))
def policy_forward(x, params, action_dim_lst, block_batch=256):
    """x: [B, state_dim] float32.  params: dict of w1,b1,w2,b2,w3,b3."""
    a1, a2 = action_dim_lst
    total = a1 + a2
    B, S = x.shape

    h1 = params["w1"].shape[1]
    h2 = params["w2"].shape[1]
    h1p = _round_up(h1, _LANE)
    h2p = _round_up(h2, _LANE)
    tp = _round_up(total, _LANE)

    # Lane-pad hidden / output feature dims with zeros (inert for the math).
    w1 = jnp.pad(params["w1"], ((0, 0), (0, h1p - h1)))
    b1 = jnp.pad(params["b1"], ((0, 0), (0, h1p - h1)))
    w2 = jnp.pad(params["w2"], ((0, h1p - h1), (0, h2p - h2)))
    b2 = jnp.pad(params["b2"], ((0, 0), (0, h2p - h2)))
    w3 = jnp.pad(params["w3"], ((0, h2p - h2), (0, tp - total)))
    b3 = jnp.pad(params["b3"], ((0, 0), (0, tp - total)))

    # Batch tiling: tile size is a multiple of the sublane count; pad B up to
    # a whole number of tiles.  Tiles stay tiny relative to VMEM on all of
    # v5e / v6e / v7x (weights ~130 KiB resident, x/out tiles a few hundred
    # KiB double-buffered), so no vmem_limit override is needed.
    TB = min(block_batch, _round_up(max(B, 1), _SUBLANE))
    TB = _round_up(TB, _SUBLANE)
    Bp = _round_up(B, TB)
    if Bp != B:
        x = jnp.pad(x, ((0, Bp - B), (0, 0)))

    out = pl.pallas_call(
        _policy_kernel(a1, a2, tp),
        out_shape=jax.ShapeDtypeStruct((Bp, tp), jnp.float32),
        grid_spec=pltpu.PrefetchScalarGridSpec(
            num_scalar_prefetch=0,
            grid=(Bp // TB,),
            in_specs=[
                pl.BlockSpec((TB, S), lambda i: (i, 0)),      # x: batch-tiled
                pl.BlockSpec((S, h1p), lambda i: (0, 0)),     # weights resident
                pl.BlockSpec((1, h1p), lambda i: (0, 0)),
                pl.BlockSpec((h1p, h2p), lambda i: (0, 0)),
                pl.BlockSpec((1, h2p), lambda i: (0, 0)),
                pl.BlockSpec((h2p, tp), lambda i: (0, 0)),
                pl.BlockSpec((1, tp), lambda i: (0, 0)),
            ],
            out_specs=pl.BlockSpec((TB, tp), lambda i: (i, 0)),
        ),
        compiler_params=pltpu.CompilerParams(
            dimension_semantics=("parallel",),   # megacore sharding on v7x
        ),
    )(x, w1, b1, w2, b2, w3, b3)

    return out[:B, :total]


def init_params(key, state_dim, fc1_dims, fc2_dims, action_dim_lst):
    """Deterministic synthetic parameters (uniform, PyTorch-Linear-like scale)."""
    total = sum(action_dim_lst)
    ks = jax.random.split(key, 6)

    def lin(kw, kb, fan_in, fan_out):
        bound = 1.0 / jnp.sqrt(jnp.float32(fan_in))
        w = jax.random.uniform(kw, (fan_in, fan_out), jnp.float32, -bound, bound)
        b = jax.random.uniform(kb, (1, fan_out), jnp.float32, -bound, bound)
        return w, b

    w1, b1 = lin(ks[0], ks[1], state_dim, fc1_dims)
    w2, b2 = lin(ks[2], ks[3], fc1_dims, fc2_dims)
    w3, b3 = lin(ks[4], ks[5], fc2_dims, total)
    return {"w1": w1, "b1": b1, "w2": w2, "b2": b2, "w3": w3, "b3": b3}


def policy_ref(x, params, action_dim_lst):
    """Pure-JAX reference for verification."""
    a1, a2 = action_dim_lst
    h = jnp.maximum(x @ params["w1"] + params["b1"], 0.0)
    h = jnp.maximum(h @ params["w2"] + params["b2"], 0.0)
    h = h @ params["w3"] + params["b3"]
    h1, h2 = h[:, :a1], h[:, a1:]
    return jnp.concatenate(
        [jax.nn.softmax(h1, axis=1), jax.nn.softmax(h2, axis=1)], axis=1)


if __name__ == "__main__":
    # Small shapes consistent with the module's forward.
    state_dim = 16
    fc1_dims = 16
    fc2_dims = 16
    action_dim_lst = (4, 6)
    total = sum(action_dim_lst)

    key = jax.random.PRNGKey(0)
    k_x, k_p, k_x2 = jax.random.split(key, 3)
    params = init_params(k_p, state_dim, fc1_dims, fc2_dims, action_dim_lst)

    # Case 1: single-tile batch.
    batch = 8
    x = jax.random.normal(k_x, (batch, state_dim), jnp.float32)
    y = jax.block_until_ready(policy_forward(x, params, action_dim_lst))
    y_ref = policy_ref(x, params, action_dim_lst)
    assert y.shape == (batch, total)
    assert jnp.allclose(y, y_ref, atol=1e-5, rtol=1e-5), "mismatch vs reference (case 1)"
    assert jnp.allclose(jnp.sum(y[:, :4], axis=1), 1.0, atol=1e-5)
    assert jnp.allclose(jnp.sum(y[:, 4:], axis=1), 1.0, atol=1e-5)

    # Case 2: multi-tile grid with batch padding (exercises the grid path).
    batch2 = 50
    x2 = jax.random.normal(k_x2, (batch2, state_dim), jnp.float32)
    y2 = jax.block_until_ready(
        policy_forward(x2, params, action_dim_lst, block_batch=16))
    y2_ref = policy_ref(x2, params, action_dim_lst)
    assert y2.shape == (batch2, total)
    assert jnp.allclose(y2, y2_ref, atol=1e-5, rtol=1e-5), "mismatch vs reference (case 2)"

    print("KERNEL_OK")
</pallas_src>

<mosaic_0001>
module attributes {stable_mosaic.version = 11 : i64} {
  func.func @kernel(%arg0: i32, %arg1: memref<8x16xf32, #tpu.memory_space<vmem>>, %arg2: memref<16x128xf32, #tpu.memory_space<vmem>>, %arg3: memref<1x128xf32, #tpu.memory_space<vmem>>, %arg4: memref<128x128xf32, #tpu.memory_space<vmem>>, %arg5: memref<1x128xf32, #tpu.memory_space<vmem>>, %arg6: memref<128x128xf32, #tpu.memory_space<vmem>>, %arg7: memref<1x128xf32, #tpu.memory_space<vmem>>, %arg8: memref<8x128xf32, #tpu.memory_space<vmem>>) attributes {dimension_semantics = [#tpu.dimension_semantics<parallel>], iteration_bounds = array<i64: 1>, scalar_prefetch = 0 : i64, scratch_operands = 0 : i64, tpu.core_type = #tpu.core_type<tc>, window_params = [{transform_indices = @transform_0, window_bounds = array<i64: 8, 16>}, {pipeline_mode = #tpu.pipeline_mode<synchronous>, transform_indices = @transform_1, window_bounds = array<i64: 16, 128>}, {pipeline_mode = #tpu.pipeline_mode<synchronous>, transform_indices = @transform_2, window_bounds = array<i64: 1, 128>}, {pipeline_mode = #tpu.pipeline_mode<synchronous>, transform_indices = @transform_3, window_bounds = array<i64: 128, 128>}, {pipeline_mode = #tpu.pipeline_mode<synchronous>, transform_indices = @transform_4, window_bounds = array<i64: 1, 128>}, {pipeline_mode = #tpu.pipeline_mode<synchronous>, transform_indices = @transform_5, window_bounds = array<i64: 128, 128>}, {pipeline_mode = #tpu.pipeline_mode<synchronous>, transform_indices = @transform_6, window_bounds = array<i64: 1, 128>}, {transform_indices = @transform_7, window_bounds = array<i64: 8, 128>}]} {
    %c0 = arith.constant 0 : index
    %c0_0 = arith.constant 0 : index
    %0 = vector.load %arg1[%c0, %c0_0] : memref<8x16xf32, #tpu.memory_space<vmem>>, vector<8x16xf32>
    %c0_1 = arith.constant 0 : index
    %c0_2 = arith.constant 0 : index
    %1 = vector.load %arg2[%c0_1, %c0_2] : memref<16x128xf32, #tpu.memory_space<vmem>>, vector<16x128xf32>
    %cst = arith.constant dense<0.000000e+00> : vector<8x128xf32>
    %2 = tpu.matmul %0, %1, %cst {dimension_numbers = #tpu.dot_dimension_numbers<[1], [0], [0], [1], [0, 0, 1, 1], [], []>} : vector<8x16xf32>, vector<16x128xf32>, vector<8x128xf32> -> vector<8x128xf32>
    %c0_3 = arith.constant 0 : index
    %c0_4 = arith.constant 0 : index
    %3 = vector.load %arg3[%c0_3, %c0_4] : memref<1x128xf32, #tpu.memory_space<vmem>>, vector<1x128xf32>
    %4 = vector.broadcast %3 : vector<1x128xf32> to vector<8x128xf32>
    %5 = arith.addf %2, %4 : vector<8x128xf32>
    %cst_5 = arith.constant 0.000000e+00 : f32
    %6 = vector.broadcast %cst_5 : f32 to vector<8x128xf32>
    %7 = arith.maximumf %5, %6 : vector<8x128xf32>
    %c0_6 = arith.constant 0 : index
    %c0_7 = arith.constant 0 : index
    %8 = vector.load %arg4[%c0_6, %c0_7] : memref<128x128xf32, #tpu.memory_space<vmem>>, vector<128x128xf32>
    %cst_8 = arith.constant dense<0.000000e+00> : vector<8x128xf32>
    %9 = tpu.matmul %7, %8, %cst_8 {dimension_numbers = #tpu.dot_dimension_numbers<[1], [0], [0], [1], [0, 0, 1, 1], [], []>} : vector<8x128xf32>, vector<128x128xf32>, vector<8x128xf32> -> vector<8x128xf32>
    %c0_9 = arith.constant 0 : index
    %c0_10 = arith.constant 0 : index
    %10 = vector.load %arg5[%c0_9, %c0_10] : memref<1x128xf32, #tpu.memory_space<vmem>>, vector<1x128xf32>
    %11 = vector.broadcast %10 : vector<1x128xf32> to vector<8x128xf32>
    %12 = arith.addf %9, %11 : vector<8x128xf32>
    %cst_11 = arith.constant 0.000000e+00 : f32
    %13 = vector.broadcast %cst_11 : f32 to vector<8x128xf32>
    %14 = arith.maximumf %12, %13 : vector<8x128xf32>
    %c0_12 = arith.constant 0 : index
    %c0_13 = arith.constant 0 : index
    %15 = vector.load %arg6[%c0_12, %c0_13] : memref<128x128xf32, #tpu.memory_space<vmem>>, vector<128x128xf32>
    %cst_14 = arith.constant dense<0.000000e+00> : vector<8x128xf32>
    %16 = tpu.matmul %14, %15, %cst_14 {dimension_numbers = #tpu.dot_dimension_numbers<[1], [0], [0], [1], [0, 0, 1, 1], [], []>} : vector<8x128xf32>, vector<128x128xf32>, vector<8x128xf32> -> vector<8x128xf32>
    %c0_15 = arith.constant 0 : index
    %c0_16 = arith.constant 0 : index
    %17 = vector.load %arg7[%c0_15, %c0_16] : memref<1x128xf32, #tpu.memory_space<vmem>>, vector<1x128xf32>
    %18 = vector.broadcast %17 : vector<1x128xf32> to vector<8x128xf32>
    %19 = arith.addf %16, %18 : vector<8x128xf32>
    %20 = tpu.iota {dimensions = array<i32: 1>} : vector<8x128xi32>
    %c4_i32 = arith.constant 4 : i32
    %21 = vector.broadcast %c4_i32 : i32 to vector<8x128xi32>
    %22 = arith.cmpi slt, %20, %21 : vector<8x128xi32>
    %c4_i32_17 = arith.constant 4 : i32
    %23 = vector.broadcast %c4_i32_17 : i32 to vector<8x128xi32>
    %24 = arith.cmpi sge, %20, %23 : vector<8x128xi32>
    %c10_i32 = arith.constant 10 : i32
    %25 = vector.broadcast %c10_i32 : i32 to vector<8x128xi32>
    %26 = arith.cmpi slt, %20, %25 : vector<8x128xi32>
    %27 = arith.andi %24, %26 : vector<8x128xi1>
    %cst_18 = arith.constant 0xFF800000 : f32
    %28 = vector.broadcast %cst_18 : f32 to vector<8x128xf32>
    %29 = arith.select %22, %19, %28 : vector<8x128xi1>, vector<8x128xf32>
    %cst_19 = arith.constant dense<0xFF800000> : vector<8xf32>
    %30 = vector.multi_reduction <maximumf>, %29, %cst_19 [1] : vector<8x128xf32> to vector<8xf32>
    %31 = vector.shape_cast %30 : vector<8xf32> to vector<8x1xf32>
    %cst_20 = arith.constant 0xFF800000 : f32
    %32 = vector.broadcast %cst_20 : f32 to vector<8x128xf32>
    %33 = arith.select %27, %19, %32 : vector<8x128xi1>, vector<8x128xf32>
    %cst_21 = arith.constant dense<0xFF800000> : vector<8xf32>
    %34 = vector.multi_reduction <maximumf>, %33, %cst_21 [1] : vector<8x128xf32> to vector<8xf32>
    %35 = vector.shape_cast %34 : vector<8xf32> to vector<8x1xf32>
    %36 = vector.shape_cast %31 : vector<8x1xf32> to vector<8x1xf32>
    %37 = vector.broadcast %36 : vector<8x1xf32> to vector<8x128xf32>
    %38 = vector.shape_cast %35 : vector<8x1xf32> to vector<8x1xf32>
    %39 = vector.broadcast %38 : vector<8x1xf32> to vector<8x128xf32>
    %40 = arith.select %22, %37, %39 : vector<8x128xi1>, vector<8x128xf32>
    %41 = arith.subf %19, %40 : vector<8x128xf32>
    %42 = math.exp %41 : vector<8x128xf32>
    %cst_22 = arith.constant 0.000000e+00 : f32
    %43 = vector.broadcast %cst_22 : f32 to vector<8x128xf32>
    %44 = arith.select %22, %42, %43 : vector<8x128xi1>, vector<8x128xf32>
    %cst_23 = arith.constant dense<0.000000e+00> : vector<8xf32>
    %45 = vector.multi_reduction <add>, %44, %cst_23 [1] : vector<8x128xf32> to vector<8xf32>
    %46 = vector.shape_cast %45 : vector<8xf32> to vector<8x1xf32>
    %cst_24 = arith.constant 0.000000e+00 : f32
    %47 = vector.broadcast %cst_24 : f32 to vector<8x128xf32>
    %48 = arith.select %27, %42, %47 : vector<8x128xi1>, vector<8x128xf32>
    %cst_25 = arith.constant dense<0.000000e+00> : vector<8xf32>
    %49 = vector.multi_reduction <add>, %48, %cst_25 [1] : vector<8x128xf32> to vector<8xf32>
    %50 = vector.shape_cast %49 : vector<8xf32> to vector<8x1xf32>
    %51 = tpu.reciprocal %46 : vector<8x1xf32> -> vector<8x1xf32>
    %52 = tpu.reciprocal %50 : vector<8x1xf32> -> vector<8x1xf32>
    %53 = vector.shape_cast %51 : vector<8x1xf32> to vector<8x1xf32>
    %54 = vector.broadcast %53 : vector<8x1xf32> to vector<8x128xf32>
    %55 = vector.shape_cast %52 : vector<8x1xf32> to vector<8x1xf32>
    %56 = vector.broadcast %55 : vector<8x1xf32> to vector<8x128xf32>
    %57 = arith.select %22, %54, %56 : vector<8x128xi1>, vector<8x128xf32>
    %58 = arith.mulf %42, %57 : vector<8x128xf32>
    %c0_26 = arith.constant 0 : index
    %c0_27 = arith.constant 0 : index
    %59 = vector.load %arg8[%c0_26, %c0_27] : memref<8x128xf32, #tpu.memory_space<vmem>>, vector<8x128xf32>
    tpu.vector_store %arg8[%c0_26, %c0_27], %58 {strides = array<i32>} : memref<8x128xf32, #tpu.memory_space<vmem>>, vector<8x128xf32>,
    return
  }
  func.func @transform_0(%arg0: i32) -> (i32, i32) {
    %c0_i32 = arith.constant 0 : i32
    %c0_i32_0 = arith.constant 0 : i32
    return %arg0, %c0_i32 : i32, i32
  }
  func.func @transform_1(%arg0: i32) -> (i32, i32) {
    %c0_i32 = arith.constant 0 : i32
    %c0_i32_0 = arith.constant 0 : i32
    %c0_i32_1 = arith.constant 0 : i32
    return %c0_i32, %c0_i32_0 : i32, i32
  }
  func.func @transform_2(%arg0: i32) -> (i32, i32) {
    %c0_i32 = arith.constant 0 : i32
    %c0_i32_0 = arith.constant 0 : i32
    %c0_i32_1 = arith.constant 0 : i32
    return %c0_i32, %c0_i32_0 : i32, i32
  }
  func.func @transform_3(%arg0: i32) -> (i32, i32) {
    %c0_i32 = arith.constant 0 : i32
    %c0_i32_0 = arith.constant 0 : i32
    %c0_i32_1 = arith.constant 0 : i32
    return %c0_i32, %c0_i32_0 : i32, i32
  }
  func.func @transform_4(%arg0: i32) -> (i32, i32) {
    %c0_i32 = arith.constant 0 : i32
    %c0_i32_0 = arith.constant 0 : i32
    %c0_i32_1 = arith.constant 0 : i32
    return %c0_i32, %c0_i32_0 : i32, i32
  }
  func.func @transform_5(%arg0: i32) -> (i32, i32) {
    %c0_i32 = arith.constant 0 : i32
    %c0_i32_0 = arith.constant 0 : i32
    %c0_i32_1 = arith.constant 0 : i32
    return %c0_i32, %c0_i32_0 : i32, i32
  }
  func.func @transform_6(%arg0: i32) -> (i32, i32) {
    %c0_i32 = arith.constant 0 : i32
    %c0_i32_0 = arith.constant 0 : i32
    %c0_i32_1 = arith.constant 0 : i32
    return %c0_i32, %c0_i32_0 : i32, i32
  }
  func.func @transform_7(%arg0: i32) -> (i32, i32) {
    %c0_i32 = arith.constant 0 : i32
    %c0_i32_0 = arith.constant 0 : i32
    return %arg0, %c0_i32 : i32, i32
  }
}

</mosaic_0001>

<bundles_post_ra>
// kernel: policy_forward.1
= control target key start
LH: loop header
LB: loop body
LE: loop exit
PB: predicated region body
PF: predicated region fallthrough
CT: control target
= control target key end

     0   :  { %v489_v1 = vmov 0.0   ;;  %vm490_vm0 = vmmov 0   ;;  %vm37_vm1 = vcmask 130048   ;;  %s693_s0 = inlined_call_operand.vmem [shape: f32[8,16], index: 0, kind: input, shape index: {}]   ;;  %s694_s1 = inlined_call_operand.vmem [shape: f32[16,128], index: 1, kind: input, shape index: {}]   ;;  %s695_s2 = inlined_call_operand.vmem [shape: f32[1,128], index: 2, kind: input, shape index: {}]   ;;  %s696_s3 = inlined_call_operand.vmem [shape: f32[128,128], index: 3, kind: input, shape index: {}]   ;;  %s697_s4 = inlined_call_operand.vmem [shape: f32[1,128], index: 4, kind: input, shape index: {}]   ;;  %s698_s5 = inlined_call_operand.vmem [shape: f32[128,128], index: 5, kind: input, shape index: {}]   ;;  %s699_s6 = inlined_call_operand.vmem [shape: f32[1,128], index: 6, kind: input, shape index: {}]   ;;  %s700_s7 = inlined_call_operand.hbm [shape: f32[8,128], index: 7, kind: output, shape index: {}]  }
   0x1   :  { %v29_v0 = vld [vmem:[%s694_s1 + $0x8] sm:$0xff]  ;;  %381 = vmatprep.subr.mxu0 %v489_v1  ;;  %v28_v2 = vld [vmem:[%s694_s1] sm:$0xff]  ;;  %385 = vmatprep.mubr.msk.f32.mxu0 %vm490_vm0, %v489_v1  ;;  %v127_v3 = vld [vmem:[%s696_s3 + $0x78] sm:$0xff] }
   0x2   :  { %382 = vmatpush3.msra.mxu0 %v29_v0  ;;  %v27_v4 = vld [vmem:[%s693_s0] sm:$0xff]  ;;  %388 = vmatprep.subr.mxu1 %v489_v1  ;;  %v126_v5 = vld [vmem:[%s696_s3 + $0x70] sm:$0xff]  ;;  %v125_v6 = vld [vmem:[%s696_s3 + $0x68] sm:$0xff] }
   0x3   :  { %383 = vmatprep.subr.mxu0 %v489_v1  ;;  %389 = vmatpush3.msra.mxu1 %v127_v3 }
   0x4   :  { %384 = vmatpush3.msra.mxu0 %v28_v2  ;;  %390 = vmatprep.subr.mxu1 %v489_v1 }
   0x5   :  { %386 = vmatmul.mubr.msk.f32.vlgmr.msra.gmra.mxu0 %vm37_vm1, %v27_v4  ;;  %391 = vmatpush3.msra.mxu1 %v126_v5 }
   0x6   :  { %12 = vsyncpa [#allocation3], 0  ;;  %392 = vmatprep.subr.mxu1 %v489_v1  ;;  %v124_v7 = vld [vmem:[%s696_s3 + $0x60] sm:$0xff]  ;;  %420 = vmatprep.mubr.msk.f32.mxu1 %vm490_vm0, %v489_v1  ;;  %v123_v8 = vld [vmem:[%s696_s3 + $0x58] sm:$0xff]  ;;  %v299_v46 = vlaneseq }
   0x7   :  { %393 = vmatpush3.msra.mxu1 %v125_v6  ;;  %423 = vmatprep.subr.mxu0 %v489_v1  ;;  %v122_v9 = vld [vmem:[%s696_s3 + $0x50] sm:$0xff]  ;;  %v121_v10 = vld [vmem:[%s696_s3 + $0x48] sm:$0xff]  ;;  %v120_v11 = vld [vmem:[%s696_s3 + $0x40] sm:$0xff] }
   0x8   :  { %394 = vmatprep.subr.mxu1 %v489_v1  ;;  %455 = vmatprep.mubr.msk.f32.mxu0 %vm490_vm0, %v489_v1  ;;  %v119_v12 = vld [vmem:[%s696_s3 + $0x38] sm:$0xff]  ;;  %v118_v13 = vld [vmem:[%s696_s3 + $0x30] sm:$0xff]  ;;  %v117_v14 = vld [vmem:[%s696_s3 + $0x28] sm:$0xff]  ;;  %v300_v47 = vand.u32 127, %v299_v46 }
   0x9   :  { %395 = vmatpush3.msra.mxu1 %v124_v7  ;;  %v116_v15 = vld [vmem:[%s696_s3 + $0x20] sm:$0xff]  ;;  %v115_v16 = vld [vmem:[%s696_s3 + $0x18] sm:$0xff]  ;;  %v114_v17 = vld [vmem:[%s696_s3 + $0x10] sm:$0xff] }
   0xa   :  { %396 = vmatprep.subr.mxu1 %v489_v1  ;;  %v113_v18 = vld [vmem:[%s696_s3 + $0x8] sm:$0xff]  ;;  %v112_v19 = vld [vmem:[%s696_s3] sm:$0xff]  ;;  %v221_v20 = vld [vmem:[%s698_s5 + $0x78] sm:$0xff]  ;;  %vm301_vm2 = vcmp.lt.s32.totalorder %v300_v47, 4  ;;  %vm302_vm3 = vcmp.ge.s32.totalorder %v300_v47, 4  ;;  %vm303_vm4 = vcmp.lt.s32.totalorder %v300_v47, 10 }
   0xb   :  { %397 = vmatpush3.msra.mxu1 %v123_v8  ;;  %v220_v21 = vld [vmem:[%s698_s5 + $0x70] sm:$0xff]  ;;  %424 = vmatpush3.msra.mxu0 %v221_v20  ;;  %v219_v22 = vld [vmem:[%s698_s5 + $0x68] sm:$0xff]  ;;  %v218_v23 = vld [vmem:[%s698_s5 + $0x60] sm:$0xff] }
   0xc   :  { %398 = vmatprep.subr.mxu1 %v489_v1  ;;  %425 = vmatprep.subr.mxu0 %v489_v1  ;;  %v217_v24 = vld [vmem:[%s698_s5 + $0x58] sm:$0xff]  ;;  %v216_v25 = vld [vmem:[%s698_s5 + $0x50] sm:$0xff]  ;;  %v215_v26 = vld [vmem:[%s698_s5 + $0x48] sm:$0xff] }
   0xd   :  { %399 = vmatpush3.msra.mxu1 %v122_v9  ;;  %426 = vmatpush3.msra.mxu0 %v220_v21  ;;  %v214_v27 = vld [vmem:[%s698_s5 + $0x40] sm:$0xff]  ;;  %v213_v28 = vld [vmem:[%s698_s5 + $0x38] sm:$0xff]  ;;  %v212_v29 = vld [vmem:[%s698_s5 + $0x30] sm:$0xff] }
   0xe   :  { %400 = vmatprep.subr.mxu1 %v489_v1  ;;  %427 = vmatprep.subr.mxu0 %v489_v1  ;;  %v211_v30 = vld [vmem:[%s698_s5 + $0x28] sm:$0xff]  ;;  %v210_v31 = vld [vmem:[%s698_s5 + $0x20] sm:$0xff]  ;;  %v209_v32 = vld [vmem:[%s698_s5 + $0x18] sm:$0xff] }
   0xf   :  { %401 = vmatpush3.msra.mxu1 %v121_v10  ;;  %428 = vmatpush3.msra.mxu0 %v219_v22  ;;  %v340_v33 = vld [vmem:[%s695_s2] ss:$0 sm:$0xff]  ;;  %v208_v38 = vld [vmem:[%s698_s5 + $0x10] sm:$0xff]  ;;  %v207_v39 = vld [vmem:[%s698_s5 + $0x8] sm:$0xff] }
  0x10   :  { %402 = vmatprep.subr.mxu1 %v489_v1  ;;  %429 = vmatprep.subr.mxu0 %v489_v1  ;;  %v206_v40 = vld [vmem:[%s698_s5] sm:$0xff]  ;;  %vm304_vm5 = vmand %vm302_vm3, %vm303_vm4 }
  0x11   :  { %403 = vmatpush3.msra.mxu1 %v120_v11  ;;  %430 = vmatpush3.msra.mxu0 %v218_v23  ;;  %v342_v41 = vld [vmem:[%s697_s4] ss:$0 sm:$0xff]  ;;  %s491_s4 = smov [#allocation2]  }
  0x12   :  { %404 = vmatprep.subr.mxu1 %v489_v1  ;;  %431 = vmatprep.subr.mxu0 %v489_v1  ;;  %v343_v48 = vld [vmem:[%s699_s6] ss:$0 sm:$0xff]  ;;  %s332_s5 = sshll.u32 %s491_s4, 4  ;;  %s333_s5 = int_to_ptr.vmem [resolvable:$true] %s332_s5 }
  0x13   :  { %405 = vmatpush3.msra.mxu1 %v119_v12  ;;  %432 = vmatpush3.msra.mxu0 %v217_v24  ;;  %s467_s6 = scalar_lea.vmem %s333_s5, 128  ;;  %p472_p1 = scmp.lt.s32.totalorder %s333_s5, %s333_s5 }
  0x14   :  { %406 = vmatprep.subr.mxu1 %v489_v1  ;;  %433 = vmatprep.subr.mxu0 %v489_v1  ;;  %p468_p0 = scmp.ne.s32.totalorder %s333_s5, %s467_s6  ;;  %p473_p2 = scmp.lt.s32.totalorder %s467_s6, %s467_s6 }
  0x15   :  { %407 = vmatpush3.msra.mxu1 %v118_v13  ;;  %434 = vmatpush3.msra.mxu0 %v216_v25 }
  0x16   :  { %408 = vmatprep.subr.mxu1 %v489_v1  ;;  %435 = vmatprep.subr.mxu0 %v489_v1  ;;  %p474_p3 = por %p473_p2, %p472_p1 }
  0x17   :  { %409 = vmatpush3.msra.mxu1 %v117_v14  ;;  %436 = vmatpush3.msra.mxu0 %v215_v26 }
  0x18   :  { %410 = vmatprep.subr.mxu1 %v489_v1  ;;  %437 = vmatprep.subr.mxu0 %v489_v1  ;;  %p475_p4 = pnand %p474_p3, %p468_p0 }
  0x19   :  { %411 = vmatpush3.msra.mxu1 %v116_v15  ;;  %438 = vmatpush3.msra.mxu0 %v214_v27 }
  0x1a   :  { %412 = vmatprep.subr.mxu1 %v489_v1  ;;  %439 = vmatprep.subr.mxu0 %v489_v1 }
  0x1b   :  { %413 = vmatpush3.msra.mxu1 %v115_v16  ;;  %440 = vmatpush3.msra.mxu0 %v213_v28 }
  0x1c   :  { %414 = vmatprep.subr.mxu1 %v489_v1  ;;  %441 = vmatprep.subr.mxu0 %v489_v1 }
  0x1d   :  { %415 = vmatpush3.msra.mxu1 %v114_v17  ;;  %442 = vmatpush3.msra.mxu0 %v212_v29 }
  0x1e   :  { %416 = vmatprep.subr.mxu1 %v489_v1  ;;  %443 = vmatprep.subr.mxu0 %v489_v1 }
  0x1f   :  { %417 = vmatpush3.msra.mxu1 %v113_v18  ;;  %444 = vmatpush3.msra.mxu0 %v211_v30 }
  0x20   :  { %418 = vmatprep.subr.mxu1 %v489_v1  ;;  %445 = vmatprep.subr.mxu0 %v489_v1 }
  0x21   :  { %419 = vmatpush3.msra.mxu1 %v112_v19  ;;  %446 = vmatpush3.msra.mxu0 %v210_v31 }
  0x22   :  { %447 = vmatprep.subr.mxu0 %v489_v1 }
  0x23   :  { %448 = vmatpush3.msra.mxu0 %v209_v32 }
  0x24   :  { %449 = vmatprep.subr.mxu0 %v489_v1 }
  0x25   :  { %450 = vmatpush3.msra.mxu0 %v208_v38 }
  0x26   :  { %451 = vmatprep.subr.mxu0 %v489_v1 }
  0x27   :  { %452 = vmatpush3.msra.mxu0 %v207_v39 }
  0x28   :  { %453 = vmatprep.subr.mxu0 %v489_v1 }
  0x29   :  { %454 = vmatpush3.msra.mxu0 %v206_v40 }
  0xc5   :  { %v107_v34 = vpop.f32.mrf.mxu0 }
  0xc6   :  { %v108_v35 = vadd.f32 %v340_v33, %v107_v34 }
  0xc7   :  { %v387_v36 = vpop.f32.mrf.mxu0 }
  0xc8   :  { %v111_v37 = vmax.f32 %v108_v35, 0.0 }
  0xca   :  { %421 = vmatmul.mubr.f32.vlgmr.msra.gmra.mxu1 %v111_v37 }
 0x18a   :  { %v201_v42 = vpop.f32.mrf.mxu1 }
 0x18b   :  { %v202_v43 = vadd.f32 %v342_v41, %v201_v42 }
 0x18c   :  { %v422_v44 = vpop.f32.mrf.mxu1 }
 0x18d   :  { %v205_v45 = vmax.f32 %v202_v43, 0.0 }
 0x18f   :  { %456 = vmatmul.mubr.f32.vlgmr.msra.gmra.mxu0 %v205_v45 }
 0x24f   :  { %v295_v49 = vpop.f32.mrf.mxu0 }
 0x250   :  { %v296_v50 = vadd.f32 %v343_v48, %v295_v49 }
 0x251   :  { %v457_v51 = vpop.f32.mrf.mxu0 }
 0x252   :  { %v305_v52 = vsel %vm301_vm2, %v296_v50, -inf  ;;  %v308_v53 = vsel %vm304_vm5, %v296_v50, -inf }
 0x253   :  { %306 = vmax.xlane.f32.xlu0 %v305_v52 }
 0x257   :  { %309 = vmax.xlane.f32.xlu0 %v308_v53 }
 0x2dc   :  { %v307_v54 = vpop.xlane.xlu0 %306 }
 0x2e0   :  { %v310_v55 = vpop.xlane.xlu0 %309 }
 0x2e1   :  { %v311_v56 = vsel %vm301_vm2, %v307_v54, %v310_v55 }
 0x2e2   :  { %v312_v57 = vsub.f32 %v296_v50, %v311_v56 }
 0x2e4   :  { %v313_v58 = vmul.f32 1.442695, %v312_v57 }
 0x2e6   :  { %461 = vpow2.f32 %v313_v58 }
 0x2f3   :  { %v462_v59 = vpop.eup %461 }
 0x2f4   :  { %v315_v60 = vsel %vm301_vm2, %v462_v59, 0.0  ;;  %v318_v61 = vsel %vm304_vm5, %v462_v59, 0.0 }
 0x2f5   :  { %316 = vadd.xlane.f32.xlu1 %v315_v60 }
 0x2f9   :  { %319 = vadd.xlane.f32.xlu1 %v318_v61 }
 0x37e   :  { %v317_v62 = vpop.xlane.xlu1 %316 }
 0x37f   :  { %463 = vrcp.f32 %v317_v62 }
 0x382   :  { %v320_v63 = vpop.xlane.xlu1 %319 }
 0x383   :  { %465 = vrcp.f32 %v320_v63 }
 0x38c   :  { %v464_v0 = vpop.eup %463 }
 0x390   :  { %v466_v1 = vpop.eup %465 }
 0x391   :  { %v323_v2 = vsel %vm301_vm2, %v464_v0, %v466_v1 }
 0x392   :  { %v324_v3 = vmul.f32 %v462_v59, %v323_v2 }
 0x394   :  { %325 = vst [vmem:[#allocation2] sm:$0xff] %v324_v3 }
 0x395   :  { %478 = shalt.err (!%p475_p4)
}
 0x396   :  { %335 = dma.vmem_to_hbm [thread:$0]  %s333_s5, 128, %s700_s7, [#allocation3]  }
 0x397   :  { %487 = dma.done.wait [#allocation3], 128  }
 0x398   :  { %488 = vsyncadd [#allocation3], 4294967168 }
 0x399   :  { %339 = vsyncpa [#allocation3], 1 }

</bundles_post_ra>
